<compile_context>
chip_gen: v6e
topology: v6e:2x2x1
jax: 0.10.0
libtpu: 0.0.40
codegen_flags: <defaults>
</compile_context>

<pallas_src>
import functools
import math

import jax
import jax.numpy as jnp
import numpy as np
from jax.experimental import pallas as pl
from jax.experimental.pallas import tpu as pltpu


def _round_up(a, b):
    return -(-a // b) * b


def _vmem_budget_bytes():
    """Per-generation VMEM budget: physical capacity minus compiler headroom."""
    cap = 64 << 20  # conservative fallback: v7x per-TensorCore VMEM
    try:
        info = pltpu.get_tpu_info()
        got = getattr(info, "vmem_capacity_bytes", None)
        if got:
            cap = int(got)
    except Exception:
        pass
    return (cap * 7) // 8


# ---------------------------------------------------------------------------
# Kernel 1: feature transform xw = x @ W1^T (tiny GEMM, hoisted out of the
# aggregation so the O(N^2) loop never recomputes the HxH transform).
# ---------------------------------------------------------------------------
def _xw_kernel(x_ref, w1t_ref, xw_ref):
    xw_ref[...] = jnp.dot(
        x_ref[...], w1t_ref[...], preferred_element_type=jnp.float32
    ).astype(xw_ref.dtype)


# ---------------------------------------------------------------------------
# Kernel 2: tiled aggregation + fused epilogue.
#   acc += adj_tile @ xw_slice                      (K reduction, f32 acc)
#   last K step:  h   = relu(acc + b1)
#                 h   = relu(h @ W2^T + b2)
#                 out = h + x_tile                  (residual)
# xw is either VMEM-resident (full-extent block, sliced with pl.ds) or a
# streamed (tk, Hp) tile — selected statically via functools.partial.
# ---------------------------------------------------------------------------
def _agg_kernel(adj_ref, xw_ref, x_ref, b1_ref, w2t_ref, b2_ref, o_ref, acc_ref,
                *, tk, xw_resident):
    k = pl.program_id(1)

    @pl.when(k == 0)
    def _():
        acc_ref[...] = jnp.zeros_like(acc_ref)

    if xw_resident:
        start = pl.multiple_of(k * tk, tk)
        xw = xw_ref[pl.ds(start, tk), :]       # slice of the resident f32 xw
    else:
        xw = xw_ref[...]                       # streamed compute_dtype tile

    acc_ref[...] += jnp.dot(
        adj_ref[...].astype(xw.dtype), xw, preferred_element_type=jnp.float32)

    @pl.when(k == pl.num_programs(1) - 1)
    def _():
        h = jnp.maximum(acc_ref[...] + b1_ref[...], 0.0)
        h = jnp.dot(h.astype(w2t_ref.dtype), w2t_ref[...],
                    preferred_element_type=jnp.float32) + b2_ref[...]
        h = jnp.maximum(h, 0.0)
        o_ref[...] = (h + x_ref[...]).astype(o_ref.dtype)


def gcn_residual_block(x, adj_norm, w_gcn, b_gcn, w_lin, b_lin, *,
                       compute_dtype=jnp.bfloat16,
                       tile_m=None, tile_k=None, xw_resident=None):
    """x: (N, H), adj_norm: (N, N), weights in PyTorch (out, in) layout.

    compute_dtype controls the dtype of the streamed O(N^2) adjacency (and the
    epilogue matmul).  bf16 halves the dominant HBM traffic on all TPU
    generations (v5e/v6e/v7x — the kernel is memory-bound on all of them);
    accumulation is always f32 and xw stays f32 when it is VMEM-resident.
    tile_m / tile_k / xw_resident override the automatic selection (testing).
    """
    N, H = x.shape
    f32 = jnp.float32
    itemsz = jnp.dtype(compute_dtype).itemsize
    Hp = _round_up(H, 128)                     # lane-dense feature dim
    budget = _vmem_budget_bytes()

    # ---- tile selection --------------------------------------------------
    if tile_m is not None or tile_k is not None:
        tm = int(tile_m) if tile_m is not None else 512
        tk = int(tile_k) if tile_k is not None else tm
        Np = _round_up(N, math.lcm(tm, tk))
    else:
        Np1 = _round_up(max(N, 1), 128)
        if Np1 <= 1024:
            # Small graphs: one grid step, everything resident.
            Np = tm = tk = Np1
        else:
            # Streaming path: large tiles amortize the ~0.35us per-step
            # overhead and reach the HBM roofline; even row-tile count keeps
            # both v7x TensorCores busy on the 'parallel' axis.
            tm = 512
            Np = _round_up(N, 2 * tm)
            tk = 2048 if Np % 2048 == 0 else 1024

    # ---- zero-pad; padded rows/cols stay exactly zero through the pipeline
    # (biases are zero-padded and relu(0)=0), so the final slice is exact.
    x_p = jnp.zeros((Np, Hp), f32).at[:N, :H].set(x.astype(f32))
    adj_p = jnp.zeros((Np, Np), compute_dtype).at[:N, :N].set(
        adj_norm.astype(compute_dtype))
    w1t_p = jnp.zeros((Hp, Hp), f32).at[:H, :H].set(w_gcn.T.astype(f32))
    w2t_p = jnp.zeros((Hp, Hp), compute_dtype).at[:H, :H].set(
        w_lin.T.astype(compute_dtype))
    b1_p = jnp.zeros((1, Hp), f32).at[0, :H].set(b_gcn.astype(f32))
    b2_p = jnp.zeros((1, Hp), f32).at[0, :H].set(b_lin.astype(f32))

    # ---- VMEM accounting / xw residency decision ---------------------------
    def _agg_buf_bytes(resident):
        xw_bytes = (2 * Np * Hp * 4) if resident else (2 * tk * Hp * itemsz)
        return (2 * tm * tk * itemsz        # double-buffered adjacency tiles
                + xw_bytes                  # resident xw (f32) or streamed tiles
                + tm * tk * 4               # f32 upcast temp for mixed-prec dot
                + 2 * tm * Hp * 4           # x tiles (residual)
                + 2 * tm * Hp * 4           # output tiles
                + Hp * Hp * itemsz          # resident W2^T
                + 2 * Hp * 4                # biases
                + tm * Hp * 4)              # f32 accumulator scratch

    if xw_resident is None:
        xw_res = _agg_buf_bytes(True) + (8 << 20) <= budget
    else:
        xw_res = bool(xw_resident)
    buf_bytes = _agg_buf_bytes(xw_res)
    xw_dtype = f32 if xw_res else compute_dtype

    # Never clamp below the live buffer set; cap at the per-generation budget.
    vmem_limit = int(min(max(buf_bytes + (8 << 20), 32 << 20), budget))
    vmem_limit = int(max(vmem_limit, buf_bytes + (4 << 20)))

    # ---- Pallas call 1: xw = x @ W1^T, tiled over rows of x ----------------
    txw = tm
    xw = pl.pallas_call(
        _xw_kernel,
        out_shape=jax.ShapeDtypeStruct((Np, Hp), xw_dtype),
        grid=(Np // txw,),
        in_specs=[
            pl.BlockSpec((txw, Hp), lambda i: (i, 0)),
            pl.BlockSpec((Hp, Hp), lambda i: (0, 0)),
        ],
        out_specs=pl.BlockSpec((txw, Hp), lambda i: (i, 0)),
        compiler_params=pltpu.CompilerParams(
            dimension_semantics=("parallel",)),
    )(x_p, w1t_p)

    # ---- Pallas call 2: streamed aggregation + fused epilogue --------------
    if xw_res:
        # Constant index_map => DMA'd once and kept VMEM-resident; no per-row-
        # tile re-streaming of xw from HBM (the +50% traffic bug in v2).
        xw_spec = pl.BlockSpec((Np, Hp), lambda i, k: (0, 0))
    else:
        xw_spec = pl.BlockSpec((tk, Hp), lambda i, k: (k, 0))

    kernel = functools.partial(_agg_kernel, tk=tk, xw_resident=xw_res)

    out_p = pl.pallas_call(
        kernel,
        out_shape=jax.ShapeDtypeStruct((Np, Hp), f32),
        grid=(Np // tm, Np // tk),
        in_specs=[
            pl.BlockSpec((tm, tk), lambda i, k: (i, k)),   # adjacency tile
            xw_spec,                                       # xw (resident/streamed)
            pl.BlockSpec((tm, Hp), lambda i, k: (i, 0)),   # x tile (residual)
            pl.BlockSpec((1, Hp), lambda i, k: (0, 0)),    # b1 (VMEM-resident)
            pl.BlockSpec((Hp, Hp), lambda i, k: (0, 0)),   # W2^T (VMEM-resident)
            pl.BlockSpec((1, Hp), lambda i, k: (0, 0)),    # b2 (VMEM-resident)
        ],
        out_specs=pl.BlockSpec((tm, Hp), lambda i, k: (i, 0)),
        scratch_shapes=[pltpu.VMEM((tm, Hp), jnp.float32)],
        compiler_params=pltpu.CompilerParams(
            dimension_semantics=("parallel", "arbitrary"),
            vmem_limit_bytes=vmem_limit,
        ),
    )(adj_p, xw, x_p, b1_p, w2t_p, b2_p)

    return out_p[:N, :H]


def build_norm_adj(edge_index, num_nodes):
    """Dense D^{-1/2}(A+I)D^{-1/2} matching PyG gcn_norm (in-degree on targets)."""
    src = edge_index[0]
    dst = edge_index[1]
    loop = jnp.arange(num_nodes, dtype=edge_index.dtype)
    src = jnp.concatenate([src, loop])
    dst = jnp.concatenate([dst, loop])
    adj = jnp.zeros((num_nodes, num_nodes), jnp.float32).at[dst, src].add(1.0)
    deg = adj.sum(axis=1)
    dinv = jnp.where(deg > 0, 1.0 / jnp.sqrt(deg), 0.0)
    return dinv[:, None] * adj * dinv[None, :]


def reference(x, adj_norm, w_gcn, b_gcn, w_lin, b_lin):
    h = adj_norm @ (x @ w_gcn.T) + b_gcn
    h = jnp.maximum(h, 0.0)
    h = h @ w_lin.T + b_lin
    h = jnp.maximum(h, 0.0)
    return h + x


def _make_inputs(key, N, H):
    k_x, k_e, k_w1, k_w2, k_b2 = jax.random.split(key, 5)
    x = jax.random.normal(k_x, (N, H), dtype=jnp.float32)
    ring_src = jnp.arange(N, dtype=jnp.int32)
    ring_dst = (ring_src + 1) % N
    extra = jax.random.randint(k_e, (2, max(8, N // 2)), 0, N, dtype=jnp.int32)
    edge_index = jnp.concatenate([jnp.stack([ring_src, ring_dst]), extra], axis=1)
    bound1 = float(np.sqrt(6.0 / (H + H)))
    w_gcn = jax.random.uniform(k_w1, (H, H), jnp.float32, -bound1, bound1)
    b_gcn = jnp.zeros((H,), jnp.float32)
    bound2 = float(1.0 / np.sqrt(H))
    w_lin = jax.random.uniform(k_w2, (H, H), jnp.float32, -bound2, bound2)
    b_lin = jax.random.uniform(k_b2, (H,), jnp.float32, -bound2, bound2)
    return x, edge_index, w_gcn, b_gcn, w_lin, b_lin


if __name__ == "__main__":
    key = jax.random.PRNGKey(0)
    k1, k2 = jax.random.split(key)

    # --- small module-consistent shapes (single-tile path) ---
    N, H = 16, 32
    x, ei, w1, b1, w2, b2 = _make_inputs(k1, N, H)
    adj = build_norm_adj(ei, N)
    ref = reference(x, adj, w1, b1, w2, b2)

    # f32 path: bit-tight accuracy.
    out_f32 = jax.block_until_ready(
        gcn_residual_block(x, adj, w1, b1, w2, b2, compute_dtype=jnp.float32))
    np.testing.assert_allclose(np.asarray(out_f32), np.asarray(ref),
                               rtol=1e-5, atol=1e-5)

    # Default path: bf16 adjacency stream + bf16 epilogue, f32 accumulation.
    out_bf16 = jax.block_until_ready(gcn_residual_block(x, adj, w1, b1, w2, b2))
    np.testing.assert_allclose(np.asarray(out_bf16), np.asarray(ref),
                               rtol=1e-1, atol=1e-1)

    # --- larger graph, auto (single-tile) path ---
    N2, H2 = 600, 32
    x2, ei2, w1b, b1b, w2b, b2b = _make_inputs(k2, N2, H2)
    adj2 = build_norm_adj(ei2, N2)
    ref2 = reference(x2, adj2, w1b, b1b, w2b, b2b)

    out2_f32 = jax.block_until_ready(
        gcn_residual_block(x2, adj2, w1b, b1b, w2b, b2b,
                           compute_dtype=jnp.float32))
    np.testing.assert_allclose(np.asarray(out2_f32), np.asarray(ref2),
                               rtol=1e-4, atol=1e-4)

    out2_bf16 = jax.block_until_ready(
        gcn_residual_block(x2, adj2, w1b, b1b, w2b, b2b))
    np.testing.assert_allclose(np.asarray(out2_bf16), np.asarray(ref2),
                               rtol=1e-1, atol=1e-1)

    # --- force the multi-row-tile / multi-K streaming grid with RESIDENT xw
    # (exercises the pl.ds slice of the VMEM-resident xw + the accumulator) ---
    out2_tiled = jax.block_until_ready(
        gcn_residual_block(x2, adj2, w1b, b1b, w2b, b2b,
                           compute_dtype=jnp.float32,
                           tile_m=256, tile_k=128, xw_resident=True))
    np.testing.assert_allclose(np.asarray(out2_tiled), np.asarray(ref2),
                               rtol=1e-4, atol=1e-4)

    # --- force the STREAMED-xw fallback path (used when N is too large for
    # resident xw to fit the per-generation VMEM budget) ---
    out2_stream = jax.block_until_ready(
        gcn_residual_block(x2, adj2, w1b, b1b, w2b, b2b,
                           compute_dtype=jnp.float32,
                           tile_m=256, tile_k=128, xw_resident=False))
    np.testing.assert_allclose(np.asarray(out2_stream), np.asarray(ref2),
                               rtol=1e-4, atol=1e-4)

    print("KERNEL_OK")
</pallas_src>

<mosaic_0001>
module attributes {stable_mosaic.version = 11 : i64} {
  func.func @_xw_kernel(%arg0: i32, %arg1: memref<128x128xf32, #tpu.memory_space<vmem>>, %arg2: memref<128x128xf32, #tpu.memory_space<vmem>>, %arg3: memref<128x128xf32, #tpu.memory_space<vmem>>) attributes {dimension_semantics = [#tpu.dimension_semantics<parallel>], iteration_bounds = array<i64: 1>, scalar_prefetch = 0 : i64, scratch_operands = 0 : i64, tpu.core_type = #tpu.core_type<tc>, window_params = [{transform_indices = @transform_0, window_bounds = array<i64: 128, 128>}, {pipeline_mode = #tpu.pipeline_mode<synchronous>, transform_indices = @transform_1, window_bounds = array<i64: 128, 128>}, {transform_indices = @transform_2, window_bounds = array<i64: 128, 128>}]} {
    %c0 = arith.constant 0 : index
    %c0_0 = arith.constant 0 : index
    %0 = vector.load %arg1[%c0, %c0_0] : memref<128x128xf32, #tpu.memory_space<vmem>>, vector<128x128xf32>
    %c0_1 = arith.constant 0 : index
    %c0_2 = arith.constant 0 : index
    %1 = vector.load %arg2[%c0_1, %c0_2] : memref<128x128xf32, #tpu.memory_space<vmem>>, vector<128x128xf32>
    %cst = arith.constant dense<0.000000e+00> : vector<128x128xf32>
    %2 = tpu.matmul %0, %1, %cst {dimension_numbers = #tpu.dot_dimension_numbers<[1], [0], [0], [1], [0, 0, 1, 1], [], []>} : vector<128x128xf32>, vector<128x128xf32>, vector<128x128xf32> -> vector<128x128xf32>
    %c0_3 = arith.constant 0 : index
    %c0_4 = arith.constant 0 : index
    %3 = vector.load %arg3[%c0_3, %c0_4] : memref<128x128xf32, #tpu.memory_space<vmem>>, vector<128x128xf32>
    tpu.vector_store %arg3[%c0_3, %c0_4], %2 {strides = array<i32>} : memref<128x128xf32, #tpu.memory_space<vmem>>, vector<128x128xf32>,
    return
  }
  func.func @transform_0(%arg0: i32) -> (i32, i32) {
    %c0_i32 = arith.constant 0 : i32
    %c0_i32_0 = arith.constant 0 : i32
    return %arg0, %c0_i32 : i32, i32
  }
  func.func @transform_1(%arg0: i32) -> (i32, i32) {
    %c0_i32 = arith.constant 0 : i32
    %c0_i32_0 = arith.constant 0 : i32
    %c0_i32_1 = arith.constant 0 : i32
    return %c0_i32, %c0_i32_0 : i32, i32
  }
  func.func @transform_2(%arg0: i32) -> (i32, i32) {
    %c0_i32 = arith.constant 0 : i32
    %c0_i32_0 = arith.constant 0 : i32
    return %arg0, %c0_i32 : i32, i32
  }
}

</mosaic_0001>

<bundles_post_ra>
// kernel: tpu_custom_call.1
= control target key start
LH: loop header
LB: loop body
LE: loop exit
PB: predicated region body
PF: predicated region fallthrough
CT: control target
= control target key end

     0   :  { %7 = vsyncpa [#allocation3], 0  ;;  %s480_s0 = inlined_call_operand.hbm [shape: f32[128,128], index: 0, kind: input, shape index: {}]   ;;  %s481_s1 = inlined_call_operand.hbm [shape: f32[128,128], index: 1, kind: input, shape index: {}]   ;;  %s482_s2 = inlined_call_operand.hbm [shape: f32[128,128], index: 2, kind: output, shape index: {}]  }
   0x1   :  { %8 = vsyncpa [#allocation6], 0 }
   0x2   :  { %9 = vsyncpa [#allocation4], 0  ;;  %s442_s9 = smov [#allocation2]  }
   0x3   :  { %s15_s10 = sshll.u32 %s442_s9, 4  ;;  %s16_s10 = int_to_ptr.vmem [resolvable:$true] %s15_s10 }
   0x4   :  { %s384_s11 = scalar_lea.vmem %s16_s10, 2048  ;;  %p389_p1 = scmp.lt.s32.totalorder %s16_s10, %s16_s10 }
   0x5   :  { %p385_p0 = scmp.ne.s32.totalorder %s16_s10, %s384_s11  ;;  %p390_p2 = scmp.lt.s32.totalorder %s384_s11, %s384_s11 }
   0x7   :  { %p391_p3 = por %p390_p2, %p389_p1 }
   0x9   :  { %p392_p4 = pnand %p391_p3, %p385_p0 }
   0xb   :  { %395 = shalt.err (!%p392_p4)
}
   0xc   :  { %s443_s12 = smov 128   ;;  %s444_s13 = smov 8  }
   0xd   :  { %21 = dma.hbm_to_vmem [thread:$0]  %s480_s0, 2048, %s16_s10, [#allocation3], %s443_s12, %s443_s12, %s444_s13  }
   0xe   :  { %s445_s16 = smov [#allocation5]  }
   0xf   :  { %s27_s17 = sshll.u32 %s445_s16, 4  ;;  %s28_s17 = int_to_ptr.vmem [resolvable:$true] %s27_s17 }
  0x10   :  { %s404_s18 = scalar_lea.vmem %s28_s17, 2048  ;;  %p409_p6 = scmp.lt.s32.totalorder %s28_s17, %s28_s17 }
  0x11   :  { %p405_p5 = scmp.ne.s32.totalorder %s28_s17, %s404_s18  ;;  %p410_p7 = scmp.lt.s32.totalorder %s404_s18, %s404_s18 }
  0x13   :  { %p411_p8 = por %p410_p7, %p409_p6 }
  0x15   :  { %p412_p9 = pnand %p411_p8, %p405_p5 }
  0x17   :  { %415 = shalt.err (!%p412_p9)
}
  0x18   :  { %33 = dma.hbm_to_vmem [thread:$0]  %s481_s1, 2048, %s28_s17, [#allocation6], %s443_s12, %s443_s12, %s444_s13  }
  0x19   :  { %436 = dma.done.wait [#allocation3], 2048  }
  0x1a   :  { %437 = vsyncadd [#allocation3], 4294965248 }
  0x1b   :  { %438 = dma.done.wait [#allocation6], 2048  }
  0x1c   :  { %439 = vsyncadd [#allocation6], 4294965248  ;;  %v71_v0 = vld [vmem:[#allocation5 + $0x78] sm:$0xff]  ;;  %v70_v1 = vld [vmem:[#allocation5 + $0x70] sm:$0xff]  ;;  %s446_s0 = smov [#allocation7]  }
  0x1d   :  { %283 = vmatprep.subr.mxu0 %v71_v0  ;;  %339 = vmatprep.subr.mxu1 %v71_v0  ;;  %v69_v2 = vld [vmem:[#allocation5 + $0x68] sm:$0xff]  ;;  %v68_v3 = vld [vmem:[#allocation5 + $0x60] sm:$0xff]  ;;  %v67_v4 = vld [vmem:[#allocation5 + $0x58] sm:$0xff]  ;;  %s238_s1 = sshll.u32 %s446_s0, 4  ;;  %s239_s1 = int_to_ptr.vmem [resolvable:$true] %s238_s1 }
  0x1e   :  { %284 = vmatpush3.msra.mxu0 %v71_v0  ;;  %355 = vmatpush3.msra.mxu1 %v71_v0  ;;  %v66_v5 = vld [vmem:[#allocation5 + $0x50] sm:$0xff]  ;;  %v65_v6 = vld [vmem:[#allocation5 + $0x48] sm:$0xff]  ;;  %v64_v7 = vld [vmem:[#allocation5 + $0x40] sm:$0xff]  ;;  %s416_s21 = scalar_lea.vmem %s239_s1, 2048  ;;  %p421_p11 = scmp.lt.s32.totalorder %s239_s1, %s239_s1 }
  0x1f   :  { %285 = vmatprep.subr.mxu0 %v70_v1  ;;  %340 = vmatprep.subr.mxu1 %v70_v1  ;;  %v63_v8 = vld [vmem:[#allocation5 + $0x38] sm:$0xff]  ;;  %v62_v9 = vld [vmem:[#allocation5 + $0x30] sm:$0xff]  ;;  %v61_v10 = vld [vmem:[#allocation5 + $0x28] sm:$0xff]  ;;  %p417_p10 = scmp.ne.s32.totalorder %s239_s1, %s416_s21  ;;  %p422_p12 = scmp.lt.s32.totalorder %s416_s21, %s416_s21 }
  0x20   :  { %286 = vmatpush3.msra.mxu0 %v70_v1  ;;  %356 = vmatpush3.msra.mxu1 %v70_v1  ;;  %v60_v11 = vld [vmem:[#allocation5 + $0x20] sm:$0xff]  ;;  %v59_v12 = vld [vmem:[#allocation5 + $0x18] sm:$0xff]  ;;  %v58_v13 = vld [vmem:[#allocation5 + $0x10] sm:$0xff] }
  0x21   :  { %287 = vmatprep.subr.mxu0 %v69_v2  ;;  %341 = vmatprep.subr.mxu1 %v69_v2  ;;  %v57_v14 = vld [vmem:[#allocation5 + $0x8] sm:$0xff]  ;;  %v56_v15 = vld [vmem:[#allocation5] sm:$0xff]  ;;  %v42_v20 = vld [vmem:[#allocation2 + $0x10] sm:$0xff]  ;;  %p423_p13 = por %p422_p12, %p421_p11 }
  0x22   :  { %288 = vmatpush3.msra.mxu0 %v69_v2  ;;  %357 = vmatpush3.msra.mxu1 %v69_v2  ;;  %v40_v16 = vld [vmem:[#allocation2] sm:$0xff]  ;;  %v41_v18 = vld [vmem:[#allocation2 + $0x8] sm:$0xff]  ;;  %v50_v21 = vld [vmem:[#allocation2 + $0x50] sm:$0xff] }
  0x23   :  { %289 = vmatprep.subr.mxu0 %v68_v3  ;;  %342 = vmatprep.subr.mxu1 %v68_v3  ;;  %v48_v17 = vld [vmem:[#allocation2 + $0x40] sm:$0xff]  ;;  %v49_v19 = vld [vmem:[#allocation2 + $0x48] sm:$0xff]  ;;  %v43_v22 = vld [vmem:[#allocation2 + $0x18] sm:$0xff]  ;;  %p424_p0 = pnand %p423_p13, %p417_p10 }
  0x24   :  { %290 = vmatpush3.msra.mxu0 %v68_v3  ;;  %358 = vmatpush3.msra.mxu1 %v68_v3  ;;  %v51_v23 = vld [vmem:[#allocation2 + $0x58] sm:$0xff]  ;;  %v44_v24 = vld [vmem:[#allocation2 + $0x20] sm:$0xff]  ;;  %v45_v26 = vld [vmem:[#allocation2 + $0x28] sm:$0xff] }
  0x25   :  { %291 = vmatprep.subr.mxu0 %v67_v4  ;;  %343 = vmatprep.subr.mxu1 %v67_v4  ;;  %v52_v25 = vld [vmem:[#allocation2 + $0x60] sm:$0xff]  ;;  %v53_v27 = vld [vmem:[#allocation2 + $0x68] sm:$0xff]  ;;  %v46_v28 = vld [vmem:[#allocation2 + $0x30] sm:$0xff] }
  0x26   :  { %292 = vmatpush3.msra.mxu0 %v67_v4  ;;  %359 = vmatpush3.msra.mxu1 %v67_v4  ;;  %v54_v29 = vld [vmem:[#allocation2 + $0x70] sm:$0xff]  ;;  %v47_v30 = vld [vmem:[#allocation2 + $0x38] sm:$0xff] }
  0x27   :  { %293 = vmatprep.subr.mxu0 %v66_v5  ;;  %344 = vmatprep.subr.mxu1 %v66_v5  ;;  %v55_v31 = vld [vmem:[#allocation2 + $0x78] sm:$0xff] }
  0x28   :  { %294 = vmatpush3.msra.mxu0 %v66_v5  ;;  %360 = vmatpush3.msra.mxu1 %v66_v5 }
  0x29   :  { %295 = vmatprep.subr.mxu0 %v65_v6  ;;  %345 = vmatprep.subr.mxu1 %v65_v6 }
  0x2a   :  { %296 = vmatpush3.msra.mxu0 %v65_v6  ;;  %361 = vmatpush3.msra.mxu1 %v65_v6 }
  0x2b   :  { %297 = vmatprep.subr.mxu0 %v64_v7  ;;  %346 = vmatprep.subr.mxu1 %v64_v7 }
  0x2c   :  { %298 = vmatpush3.msra.mxu0 %v64_v7  ;;  %362 = vmatpush3.msra.mxu1 %v64_v7 }
  0x2d   :  { %299 = vmatprep.subr.mxu0 %v63_v8  ;;  %347 = vmatprep.subr.mxu1 %v63_v8 }
  0x2e   :  { %300 = vmatpush3.msra.mxu0 %v63_v8  ;;  %363 = vmatpush3.msra.mxu1 %v63_v8 }
  0x2f   :  { %301 = vmatprep.subr.mxu0 %v62_v9  ;;  %348 = vmatprep.subr.mxu1 %v62_v9 }
  0x30   :  { %302 = vmatpush3.msra.mxu0 %v62_v9  ;;  %364 = vmatpush3.msra.mxu1 %v62_v9 }
  0x31   :  { %303 = vmatprep.subr.mxu0 %v61_v10  ;;  %349 = vmatprep.subr.mxu1 %v61_v10 }
  0x32   :  { %304 = vmatpush3.msra.mxu0 %v61_v10  ;;  %365 = vmatpush3.msra.mxu1 %v61_v10 }
  0x33   :  { %305 = vmatprep.subr.mxu0 %v60_v11  ;;  %350 = vmatprep.subr.mxu1 %v60_v11 }
  0x34   :  { %306 = vmatpush3.msra.mxu0 %v60_v11  ;;  %366 = vmatpush3.msra.mxu1 %v60_v11 }
  0x35   :  { %307 = vmatprep.subr.mxu0 %v59_v12  ;;  %351 = vmatprep.subr.mxu1 %v59_v12 }
  0x36   :  { %308 = vmatpush3.msra.mxu0 %v59_v12  ;;  %367 = vmatpush3.msra.mxu1 %v59_v12 }
  0x37   :  { %309 = vmatprep.subr.mxu0 %v58_v13  ;;  %352 = vmatprep.subr.mxu1 %v58_v13 }
  0x38   :  { %310 = vmatpush3.msra.mxu0 %v58_v13  ;;  %368 = vmatpush3.msra.mxu1 %v58_v13 }
  0x39   :  { %311 = vmatprep.subr.mxu0 %v57_v14  ;;  %353 = vmatprep.subr.mxu1 %v57_v14 }
  0x3a   :  { %312 = vmatpush3.msra.mxu0 %v57_v14  ;;  %369 = vmatpush3.msra.mxu1 %v57_v14 }
  0x3b   :  { %313 = vmatprep.subr.mxu0 %v56_v15  ;;  %354 = vmatprep.subr.mxu1 %v56_v15 }
  0x3c   :  { %314 = vmatpush3.msra.mxu0 %v56_v15  ;;  %370 = vmatpush3.msra.mxu1 %v56_v15 }
  0x3d   :  { %315 = vmatprep.mubr.f32.mxu0 %v40_v16  ;;  %327 = vmatprep.mubr.f32.mxu1 %v48_v17 }
  0x3e   :  { %316 = vmatmul.mubr.f32.vlgmr.msra.gmra.mxu0 %v41_v18  ;;  %328 = vmatmul.mubr.f32.vlgmr.msra.gmra.mxu1 %v49_v19 }
  0x3f   :  { %318 = vmatprep.mubr.f32.mxu0 %v42_v20  ;;  %330 = vmatprep.mubr.f32.mxu1 %v50_v21 }
  0x42   :  { %319 = vmatmul.mubr.f32.gmra.mxu0 %v43_v22  ;;  %331 = vmatmul.mubr.f32.gmra.mxu1 %v51_v23 }
  0x43   :  { %321 = vmatprep.mubr.f32.mxu0 %v44_v24  ;;  %333 = vmatprep.mubr.f32.mxu1 %v52_v25 }
  0x46   :  { %322 = vmatmul.mubr.f32.gmra.mxu0 %v45_v26  ;;  %334 = vmatmul.mubr.f32.gmra.mxu1 %v53_v27 }
  0x47   :  { %324 = vmatprep.mubr.f32.mxu0 %v46_v28  ;;  %336 = vmatprep.mubr.f32.mxu1 %v54_v29 }
  0x4a   :  { %325 = vmatmul.mubr.f32.gmra.mxu0 %v47_v30  ;;  %337 = vmatmul.mubr.f32.gmra.mxu1 %v55_v31 }
  0xfe   :  { %v317_v32 = vpop.f32.mrf.mxu0  ;;  %v329_v33 = vpop.f32.mrf.mxu1 }
  0xff   :  { %218 = vst [vmem:[#allocation7 + $0x8] sm:$0xff] %v317_v32  ;;  %226 = vst [vmem:[#allocation7 + $0x48] sm:$0xff] %v329_v33 }
 0x100   :  { %v138_v34 = vpop.f32.mrf.mxu0  ;;  %v178_v35 = vpop.f32.mrf.mxu1 }
 0x101   :  { %217 = vst [vmem:[#allocation7] sm:$0xff] %v138_v34  ;;  %225 = vst [vmem:[#allocation7 + $0x40] sm:$0xff] %v178_v35 }
 0x102   :  { %v320_v36 = vpop.f32.mrf.mxu0  ;;  %v332_v37 = vpop.f32.mrf.mxu1 }
 0x103   :  { %220 = vst [vmem:[#allocation7 + $0x18] sm:$0xff] %v320_v36  ;;  %228 = vst [vmem:[#allocation7 + $0x58] sm:$0xff] %v332_v37 }
 0x104   :  { %v148_v38 = vpop.f32.mrf.mxu0  ;;  %v188_v39 = vpop.f32.mrf.mxu1 }
 0x105   :  { %219 = vst [vmem:[#allocation7 + $0x10] sm:$0xff] %v148_v38  ;;  %227 = vst [vmem:[#allocation7 + $0x50] sm:$0xff] %v188_v39 }
 0x106   :  { %v323_v40 = vpop.f32.mrf.mxu0  ;;  %v335_v41 = vpop.f32.mrf.mxu1 }
 0x107   :  { %222 = vst [vmem:[#allocation7 + $0x28] sm:$0xff] %v323_v40  ;;  %230 = vst [vmem:[#allocation7 + $0x68] sm:$0xff] %v335_v41 }
 0x108   :  { %v158_v42 = vpop.f32.mrf.mxu0  ;;  %v198_v43 = vpop.f32.mrf.mxu1 }
 0x109   :  { %221 = vst [vmem:[#allocation7 + $0x20] sm:$0xff] %v158_v42  ;;  %229 = vst [vmem:[#allocation7 + $0x60] sm:$0xff] %v198_v43 }
 0x10a   :  { %v326_v44 = vpop.f32.mrf.mxu0  ;;  %v338_v45 = vpop.f32.mrf.mxu1 }
 0x10b   :  { %224 = vst [vmem:[#allocation7 + $0x38] sm:$0xff] %v326_v44  ;;  %232 = vst [vmem:[#allocation7 + $0x78] sm:$0xff] %v338_v45 }
 0x10c   :  { %v168_v46 = vpop.f32.mrf.mxu0  ;;  %v208_v47 = vpop.f32.mrf.mxu1 }
 0x10d   :  { %223 = vst [vmem:[#allocation7 + $0x30] sm:$0xff] %v168_v46  ;;  %231 = vst [vmem:[#allocation7 + $0x70] sm:$0xff] %v208_v47 }
 0x10e   :  { %427 = shalt.err (!%p424_p0)
}
 0x10f   :  { %244 = dma.vmem_to_hbm [thread:$0]  %s239_s1, 2048, %s482_s2, [#allocation4], %s443_s12, %s443_s12, %s444_s13  }
 0x110   :  { %440 = dma.done.wait [#allocation4], 2048  }
 0x111   :  { %441 = vsyncadd [#allocation4], 4294965248 }
 0x112   :  { %248 = vsyncpa [#allocation3], 1 }
 0x113   :  { %249 = vsyncpa [#allocation6], 1 }
 0x114   :  { %250 = vsyncpa [#allocation4], 1 }

</bundles_post_ra>
